<compile_context>
chip_gen: v7x
topology: tpu7x:2x2x1
jax: 0.10.0
libtpu: 0.0.40
codegen_flags: <defaults>
</compile_context>

<pallas_src>
import jax
import jax.numpy as jnp
from jax.experimental import pallas as pl
from jax.experimental.pallas import tpu as pltpu

BN_EPS = 1e-5
H_PAD = 128     # hidden 100 -> 128 (lane-dense)
O_PAD = 128     # output   2 -> 128 (lane-dense stores, no masked vst)
MAX_TILE = 256  # batch rows per grid step once B exceeds this


def _make_kernel(b_actual: int, tb: int):
    inv_n = 1.0 / float(b_actual)

    def kernel(x_ref, w1_ref, pvec_ref, w2_ref, o_ref, h_ref, sum_ref, ssq_ref):
        p = pl.program_id(0)                  # 0 = stats pass, 1 = output pass
        i = pl.program_id(1)                  # batch tile
        off = pl.multiple_of(i * tb, tb)

        @pl.when(p == 0)
        def _pass_a():
            @pl.when(i == 0)
            def _():
                sum_ref[...] = jnp.zeros_like(sum_ref)
                ssq_ref[...] = jnp.zeros_like(ssq_ref)

            # in-kernel bf16 cast: x arrives f32, read from HBM exactly once.
            h = jnp.dot(x_ref[...].astype(jnp.bfloat16), w1_ref[...],
                        preferred_element_type=jnp.float32)
            # Linear bias b1 is intentionally omitted: it cancels exactly in
            # training-mode BatchNorm. Padded batch rows / padded lanes of h
            # are exact zeros, so no mask is needed on the accumulators.
            sum_ref[...] += jnp.sum(h, axis=0, keepdims=True)
            ssq_ref[...] += jnp.sum(h * h, axis=0, keepdims=True)
            h_ref[pl.ds(off, tb), :] = h      # stash h, resident for pass B

        @pl.when(p == 1)
        def _pass_b():
            gamma = pvec_ref[0:1, :]
            beta = pvec_ref[1:2, :]
            b2 = pvec_ref[2:3, :]

            mean = sum_ref[...] * inv_n
            # biased batch variance via E[h^2] - mean^2 (two-pass accumulators).
            # NOTE: mild cancellation risk if |mean| >> std of pre-BN features.
            var = ssq_ref[...] * inv_n - mean * mean
            scale = gamma * jax.lax.rsqrt(var + BN_EPS)   # gamma folded into scale

            h = h_ref[pl.ds(off, tb), :]
            hn = jnp.maximum((h - mean) * scale + beta, 0.0)
            # Linear(100 -> 2) padded to 128x128; padded lanes carry exact zeros.
            out = jnp.dot(hn.astype(jnp.bfloat16), w2_ref[...],
                          preferred_element_type=jnp.float32) + b2
            o_ref[...] = out.astype(o_ref.dtype)

    return kernel


def prepare_params(params):
    """One-time parameter padding/packing (hoisted out of the per-call path)."""
    w1, b1, gamma, beta, w2, b2 = params
    del b1  # cancels in training-mode BatchNorm; deliberately not sent to the kernel
    w1p = jnp.pad(w1, ((0, 0), (0, H_PAD - w1.shape[1]))).astype(jnp.bfloat16)
    pvec = jnp.concatenate(
        [
            jnp.pad(gamma, ((0, 0), (0, H_PAD - gamma.shape[1]))),
            jnp.pad(beta, ((0, 0), (0, H_PAD - beta.shape[1]))),
            jnp.pad(b2, ((0, 0), (0, O_PAD - b2.shape[1]))),
        ],
        axis=0,
    ).astype(jnp.float32)                                   # (3, 128) f32
    w2p = jnp.pad(
        w2, ((0, H_PAD - w2.shape[0]), (0, O_PAD - w2.shape[1]))
    ).astype(jnp.bfloat16)                                  # (128, 128) bf16
    return (w1p, pvec, w2p)


def domain_classifier_forward(feature, alpha, prepared_params):
    # ReverseLayerF is identity in the forward pass -> alpha unused here.
    del alpha
    w1p, pvec, w2p = prepared_params
    B = feature.shape[0]

    # batch tiling: pad to a multiple of 16 (bf16 sublane packing), cap tiles at
    # MAX_TILE rows so per-step VMEM residency is batch-independent.
    b16 = max(16, -(-B // 16) * 16)
    tb = min(MAX_TILE, b16)
    b_pad = -(-B // tb) * tb
    nb = b_pad // tb

    x = feature.astype(jnp.float32)
    if b_pad != B:
        x = jnp.pad(x, ((0, b_pad - B), (0, 0)))   # zero rows: inert for BN stats

    # explicit scoped-VMEM budget with headroom (v5e default is only 16 MiB).
    tile_bytes = (2 * tb * 512 * 4            # x tiles (f32, double-buffered)
                  + 2 * 512 * H_PAD * 2       # w1 (bf16)
                  + 2 * 3 * H_PAD * 4         # pvec
                  + 2 * H_PAD * O_PAD * 2     # w2 (bf16)
                  + 2 * tb * O_PAD * 2)       # out tiles (bf16, double-buffered)
    scratch_bytes = b_pad * H_PAD * 4 + 2 * 8 * H_PAD * 4
    vmem_bytes = min(
        max(int(1.5 * (tile_bytes + scratch_bytes)) + (4 << 20), 32 << 20),
        100 << 20,
    )

    grid_spec = pltpu.PrefetchScalarGridSpec(
        num_scalar_prefetch=0,
        grid=(2, nb),   # (pass, batch tile): pass 0 = stats, pass 1 = output
        in_specs=[
            # x is only needed in pass 0; in pass 1 the index pins to block 0 so
            # the pipeline stops refetching it after one extra tile.
            pl.BlockSpec((tb, 512), lambda p, i: (i * (1 - p), 0)),
            pl.BlockSpec((512, H_PAD), lambda p, i: (0, 0)),
            pl.BlockSpec((3, H_PAD), lambda p, i: (0, 0)),
            pl.BlockSpec((H_PAD, O_PAD), lambda p, i: (0, 0)),
        ],
        # output blocks are only produced in pass 1; during pass 0 the index is
        # pinned to block 0 (never written back until pass 1 fills it).
        out_specs=pl.BlockSpec((tb, O_PAD), lambda p, i: (i * p, 0)),
        scratch_shapes=[
            pltpu.VMEM((b_pad, H_PAD), jnp.float32),   # resident h (~512 B/row)
            pltpu.VMEM((1, H_PAD), jnp.float32),       # sum accumulator
            pltpu.VMEM((1, H_PAD), jnp.float32),       # sum-of-squares accumulator
        ],
    )

    out = pl.pallas_call(
        _make_kernel(B, tb),
        out_shape=jax.ShapeDtypeStruct((b_pad, O_PAD), jnp.bfloat16),
        grid_spec=grid_spec,
        compiler_params=pltpu.CompilerParams(
            dimension_semantics=("arbitrary", "arbitrary"),
            vmem_limit_bytes=vmem_bytes,
        ),
    )(x, w1p, pvec, w2p)
    return out[:B, :2]


def init_params(key):
    k1, k2, k3, k4 = jax.random.split(key, 4)
    # Linear(512, 100): torch weight (100, 512) -> stored transposed (512, 100)
    w1 = jax.random.normal(k1, (512, 100), jnp.float32) * 0.02
    b1 = jax.random.normal(k2, (1, 100), jnp.float32) * 0.02
    # BatchNorm1d(100): gamma=1, beta=0 (torch default init)
    gamma = jnp.ones((1, 100), jnp.float32)
    beta = jnp.zeros((1, 100), jnp.float32)
    # Linear(100, 2): torch weight (2, 100) -> stored transposed (100, 2)
    w2 = jax.random.normal(k3, (100, 2), jnp.float32) * 0.02
    b2 = jax.random.normal(k4, (1, 2), jnp.float32) * 0.02
    return (w1, b1, gamma, beta, w2, b2)


if __name__ == "__main__":
    key = jax.random.PRNGKey(0)
    k_feat, k_params = jax.random.split(key)

    B = 12  # small demo batch; not a multiple of 16 -> exercises batch padding
    feature = jax.random.normal(k_feat, (B, 512), jnp.float32)
    alpha = 0.5  # gradient-reversal strength; no effect on the forward output
    params = init_params(k_params)

    prepped = prepare_params(params)  # one-time prep, hoisted out of the hot path
    out = domain_classifier_forward(feature, alpha, prepped)
    out = jax.block_until_ready(out)

    # plain-JAX reference mirroring the module (bf16 first matmul to match the
    # kernel's MXU precision; includes b1, which cancels in training-mode BN).
    w1, b1, gamma, beta, w2, b2 = params
    h = jnp.dot(feature.astype(jnp.bfloat16), w1.astype(jnp.bfloat16),
                preferred_element_type=jnp.float32) + b1
    mean = jnp.mean(h, axis=0, keepdims=True)
    var = jnp.mean((h - mean) ** 2, axis=0, keepdims=True)
    hn = jnp.maximum((h - mean) / jnp.sqrt(var + BN_EPS) * gamma + beta, 0.0)
    ref = hn @ w2 + b2

    assert out.shape == (B, 2)
    assert out.dtype == jnp.bfloat16
    # tolerance covers bf16 second matmul + bf16 output rounding (~2-3e-3 worst case)
    assert jnp.allclose(out.astype(jnp.float32), ref, atol=8e-3, rtol=8e-3)

    print("KERNEL_OK")
</pallas_src>

<mosaic_0001>
module attributes {stable_mosaic.version = 11 : i64} {
  func.func @kernel(%arg0: i32, %arg1: i32, %arg2: memref<16x512xf32, #tpu.memory_space<vmem>>, %arg3: memref<512x128xbf16, #tpu.memory_space<vmem>>, %arg4: memref<3x128xf32, #tpu.memory_space<vmem>>, %arg5: memref<128x128xbf16, #tpu.memory_space<vmem>>, %arg6: memref<16x128xbf16, #tpu.memory_space<vmem>>, %arg7: memref<16x128xf32, #tpu.memory_space<vmem>>, %arg8: memref<1x128xf32, #tpu.memory_space<vmem>>, %arg9: memref<1x128xf32, #tpu.memory_space<vmem>>) attributes {dimension_semantics = [#tpu.dimension_semantics<arbitrary>, #tpu.dimension_semantics<arbitrary>], iteration_bounds = array<i64: 2, 1>, scalar_prefetch = 0 : i64, scratch_operands = 3 : i64, tpu.core_type = #tpu.core_type<tc>, window_params = [{transform_indices = @transform_0, window_bounds = array<i64: 16, 512>}, {pipeline_mode = #tpu.pipeline_mode<synchronous>, transform_indices = @transform_1, window_bounds = array<i64: 512, 128>}, {pipeline_mode = #tpu.pipeline_mode<synchronous>, transform_indices = @transform_2, window_bounds = array<i64: 3, 128>}, {pipeline_mode = #tpu.pipeline_mode<synchronous>, transform_indices = @transform_3, window_bounds = array<i64: 128, 128>}, {transform_indices = @transform_4, window_bounds = array<i64: 16, 128>}]} {
    %c16_i32 = arith.constant 16 : i32
    %0 = arith.muli %arg1, %c16_i32 : i32
    %1 = tpu.assume_multiple %0, 16 : i32
    %c0_i32 = arith.constant 0 : i32
    %2 = arith.cmpi eq, %arg0, %c0_i32 : i32
    %3 = arith.extui %2 : i1 to i32
    %c0_i32_0 = arith.constant 0 : i32
    %4 = arith.cmpi ne, %3, %c0_i32_0 : i32
    scf.if %4 {
      %c0_i32_2 = arith.constant 0 : i32
      %8 = arith.cmpi eq, %arg1, %c0_i32_2 : i32
      %9 = arith.extui %8 : i1 to i32
      %c0_i32_3 = arith.constant 0 : i32
      %10 = arith.cmpi ne, %9, %c0_i32_3 : i32
      scf.if %10 {
        %cst_18 = arith.constant 0.000000e+00 : f32
        %28 = vector.broadcast %cst_18 : f32 to vector<1x128xf32>
        %c0_19 = arith.constant 0 : index
        %c0_20 = arith.constant 0 : index
        %29 = vector.load %arg8[%c0_19, %c0_20] : memref<1x128xf32, #tpu.memory_space<vmem>>, vector<1x128xf32>
        tpu.vector_store %arg8[%c0_19, %c0_20], %28 {strides = array<i32>} : memref<1x128xf32, #tpu.memory_space<vmem>>, vector<1x128xf32>,
        %cst_21 = arith.constant 0.000000e+00 : f32
        %30 = vector.broadcast %cst_21 : f32 to vector<1x128xf32>
        %c0_22 = arith.constant 0 : index
        %c0_23 = arith.constant 0 : index
        %31 = vector.load %arg9[%c0_22, %c0_23] : memref<1x128xf32, #tpu.memory_space<vmem>>, vector<1x128xf32>
        tpu.vector_store %arg9[%c0_22, %c0_23], %30 {strides = array<i32>} : memref<1x128xf32, #tpu.memory_space<vmem>>, vector<1x128xf32>,
      } else {
      }
      %c0 = arith.constant 0 : index
      %c0_4 = arith.constant 0 : index
      %11 = vector.load %arg2[%c0, %c0_4] : memref<16x512xf32, #tpu.memory_space<vmem>>, vector<16x512xf32>
      %12 = arith.truncf %11 : vector<16x512xf32> to vector<16x512xbf16>
      %c0_5 = arith.constant 0 : index
      %c0_6 = arith.constant 0 : index
      %13 = vector.load %arg3[%c0_5, %c0_6] : memref<512x128xbf16, #tpu.memory_space<vmem>>, vector<512x128xbf16>
      %cst = arith.constant dense<0.000000e+00> : vector<16x128xf32>
      %14 = tpu.matmul %12, %13, %cst {dimension_numbers = #tpu.dot_dimension_numbers<[1], [0], [0], [1], [0, 0, 1, 1], [], []>} : vector<16x512xbf16>, vector<512x128xbf16>, vector<16x128xf32> -> vector<16x128xf32>
      %c0_7 = arith.constant 0 : index
      %c0_8 = arith.constant 0 : index
      %15 = vector.load %arg8[%c0_7, %c0_8] : memref<1x128xf32, #tpu.memory_space<vmem>>, vector<1x128xf32>
      %cst_9 = arith.constant dense<0.000000e+00> : vector<128xf32>
      %16 = vector.multi_reduction <add>, %14, %cst_9 [0] : vector<16x128xf32> to vector<128xf32>
      %17 = vector.shape_cast %16 : vector<128xf32> to vector<1x128xf32>
      %18 = arith.addf %15, %17 : vector<1x128xf32>
      %c0_10 = arith.constant 0 : index
      %c0_11 = arith.constant 0 : index
      %19 = vector.load %arg8[%c0_10, %c0_11] : memref<1x128xf32, #tpu.memory_space<vmem>>, vector<1x128xf32>
      tpu.vector_store %arg8[%c0_10, %c0_11], %18 {strides = array<i32>} : memref<1x128xf32, #tpu.memory_space<vmem>>, vector<1x128xf32>,
      %c0_12 = arith.constant 0 : index
      %c0_13 = arith.constant 0 : index
      %20 = vector.load %arg9[%c0_12, %c0_13] : memref<1x128xf32, #tpu.memory_space<vmem>>, vector<1x128xf32>
      %21 = arith.mulf %14, %14 : vector<16x128xf32>
      %cst_14 = arith.constant dense<0.000000e+00> : vector<128xf32>
      %22 = vector.multi_reduction <add>, %21, %cst_14 [0] : vector<16x128xf32> to vector<128xf32>
      %23 = vector.shape_cast %22 : vector<128xf32> to vector<1x128xf32>
      %24 = arith.addf %20, %23 : vector<1x128xf32>
      %c0_15 = arith.constant 0 : index
      %c0_16 = arith.constant 0 : index
      %25 = vector.load %arg9[%c0_15, %c0_16] : memref<1x128xf32, #tpu.memory_space<vmem>>, vector<1x128xf32>
      tpu.vector_store %arg9[%c0_15, %c0_16], %24 {strides = array<i32>} : memref<1x128xf32, #tpu.memory_space<vmem>>, vector<1x128xf32>,
      %26 = arith.index_cast %1 : i32 to index
      %c0_17 = arith.constant 0 : index
      %27 = vector.load %arg7[%26, %c0_17] : memref<16x128xf32, #tpu.memory_space<vmem>>, vector<16x128xf32>
      tpu.vector_store %arg7[%26, %c0_17], %14 {strides = array<i32>} : memref<16x128xf32, #tpu.memory_space<vmem>>, vector<16x128xf32>,
    } else {
    }
    %c1_i32 = arith.constant 1 : i32
    %5 = arith.cmpi eq, %arg0, %c1_i32 : i32
    %6 = arith.extui %5 : i1 to i32
    %c0_i32_1 = arith.constant 0 : i32
    %7 = arith.cmpi ne, %6, %c0_i32_1 : i32
    scf.if %7 {
      %c0 = arith.constant 0 : index
      %c0_2 = arith.constant 0 : index
      %8 = vector.load %arg4[%c0, %c0_2] : memref<3x128xf32, #tpu.memory_space<vmem>>, vector<1x128xf32>
      %c1 = arith.constant 1 : index
      %c0_3 = arith.constant 0 : index
      %9 = vector.load %arg4[%c1, %c0_3] : memref<3x128xf32, #tpu.memory_space<vmem>>, vector<1x128xf32>
      %c2 = arith.constant 2 : index
      %c0_4 = arith.constant 0 : index
      %10 = vector.load %arg4[%c2, %c0_4] : memref<3x128xf32, #tpu.memory_space<vmem>>, vector<1x128xf32>
      %c0_5 = arith.constant 0 : index
      %c0_6 = arith.constant 0 : index
      %11 = vector.load %arg8[%c0_5, %c0_6] : memref<1x128xf32, #tpu.memory_space<vmem>>, vector<1x128xf32>
      %cst = arith.constant 0.0833333358 : f32
      %12 = vector.broadcast %cst : f32 to vector<1x128xf32>
      %13 = arith.mulf %11, %12 : vector<1x128xf32>
      %c0_7 = arith.constant 0 : index
      %c0_8 = arith.constant 0 : index
      %14 = vector.load %arg9[%c0_7, %c0_8] : memref<1x128xf32, #tpu.memory_space<vmem>>, vector<1x128xf32>
      %cst_9 = arith.constant 0.0833333358 : f32
      %15 = vector.broadcast %cst_9 : f32 to vector<1x128xf32>
      %16 = arith.mulf %14, %15 : vector<1x128xf32>
      %17 = arith.mulf %13, %13 : vector<1x128xf32>
      %18 = arith.subf %16, %17 : vector<1x128xf32>
      %cst_10 = arith.constant 9.99999974E-6 : f32
      %19 = vector.broadcast %cst_10 : f32 to vector<1x128xf32>
      %20 = arith.addf %18, %19 : vector<1x128xf32>
      %21 = math.rsqrt %20 : vector<1x128xf32>
      %22 = arith.mulf %8, %21 : vector<1x128xf32>
      %23 = arith.index_cast %1 : i32 to index
      %c0_11 = arith.constant 0 : index
      %24 = vector.load %arg7[%23, %c0_11] : memref<16x128xf32, #tpu.memory_space<vmem>>, vector<16x128xf32>
      %25 = vector.broadcast %13 : vector<1x128xf32> to vector<16x128xf32>
      %26 = arith.subf %24, %25 : vector<16x128xf32>
      %27 = vector.broadcast %22 : vector<1x128xf32> to vector<16x128xf32>
      %28 = arith.mulf %26, %27 : vector<16x128xf32>
      %29 = vector.broadcast %9 : vector<1x128xf32> to vector<16x128xf32>
      %30 = arith.addf %28, %29 : vector<16x128xf32>
      %cst_12 = arith.constant 0.000000e+00 : f32
      %31 = vector.broadcast %cst_12 : f32 to vector<16x128xf32>
      %32 = arith.maximumf %30, %31 : vector<16x128xf32>
      %33 = arith.truncf %32 : vector<16x128xf32> to vector<16x128xbf16>
      %c0_13 = arith.constant 0 : index
      %c0_14 = arith.constant 0 : index
      %34 = vector.load %arg5[%c0_13, %c0_14] : memref<128x128xbf16, #tpu.memory_space<vmem>>, vector<128x128xbf16>
      %cst_15 = arith.constant dense<0.000000e+00> : vector<16x128xf32>
      %35 = tpu.matmul %33, %34, %cst_15 {dimension_numbers = #tpu.dot_dimension_numbers<[1], [0], [0], [1], [0, 0, 1, 1], [], []>} : vector<16x128xbf16>, vector<128x128xbf16>, vector<16x128xf32> -> vector<16x128xf32>
      %36 = vector.broadcast %10 : vector<1x128xf32> to vector<16x128xf32>
      %37 = arith.addf %35, %36 : vector<16x128xf32>
      %38 = arith.truncf %37 : vector<16x128xf32> to vector<16x128xbf16>
      %c0_16 = arith.constant 0 : index
      %c0_17 = arith.constant 0 : index
      %39 = vector.load %arg6[%c0_16, %c0_17] : memref<16x128xbf16, #tpu.memory_space<vmem>>, vector<16x128xbf16>
      tpu.vector_store %arg6[%c0_16, %c0_17], %38 {strides = array<i32>} : memref<16x128xbf16, #tpu.memory_space<vmem>>, vector<16x128xbf16>,
    } else {
    }
    return
  }
  func.func @transform_0(%arg0: i32, %arg1: i32) -> (i32, i32) {
    %c1_i32 = arith.constant 1 : i32
    %0 = arith.subi %c1_i32, %arg0 : i32
    %1 = arith.muli %arg1, %0 : i32
    %c0_i32 = arith.constant 0 : i32
    %c0_i32_0 = arith.constant 0 : i32
    return %1, %c0_i32 : i32, i32
  }
  func.func @transform_1(%arg0: i32, %arg1: i32) -> (i32, i32) {
    %c0_i32 = arith.constant 0 : i32
    %c0_i32_0 = arith.constant 0 : i32
    %c0_i32_1 = arith.constant 0 : i32
    return %c0_i32, %c0_i32_0 : i32, i32
  }
  func.func @transform_2(%arg0: i32, %arg1: i32) -> (i32, i32) {
    %c0_i32 = arith.constant 0 : i32
    %c0_i32_0 = arith.constant 0 : i32
    %c0_i32_1 = arith.constant 0 : i32
    return %c0_i32, %c0_i32_0 : i32, i32
  }
  func.func @transform_3(%arg0: i32, %arg1: i32) -> (i32, i32) {
    %c0_i32 = arith.constant 0 : i32
    %c0_i32_0 = arith.constant 0 : i32
    %c0_i32_1 = arith.constant 0 : i32
    return %c0_i32, %c0_i32_0 : i32, i32
  }
  func.func @transform_4(%arg0: i32, %arg1: i32) -> (i32, i32) {
    %0 = arith.muli %arg1, %arg0 : i32
    %c0_i32 = arith.constant 0 : i32
    %c0_i32_0 = arith.constant 0 : i32
    return %0, %c0_i32 : i32, i32
  }
}

</mosaic_0001>

<bundles_post_ra>
// kernel: tpu_custom_call.1
= control target key start
LH: loop header
LB: loop body
LE: loop exit
PB: predicated region body
PF: predicated region fallthrough
CT: control target
= control target key end

     0   :  { %9 = vsyncpa [#allocation6], 0  ;;  %s1550_s0 = inlined_call_operand.hbm [shape: f32[16,512], index: 0, kind: input, shape index: {}]   ;;  %s1551_s1 = inlined_call_operand.hbm [shape: bf16[512,128], index: 1, kind: input, shape index: {}]   ;;  %s1552_s2 = inlined_call_operand.vmem [shape: f32[3,128], index: 2, kind: input, shape index: {}]   ;;  %s1553_s3 = inlined_call_operand.hbm [shape: bf16[128,128], index: 3, kind: input, shape index: {}]   ;;  %s1554_s4 = inlined_call_operand.hbm [shape: bf16[16,128], index: 4, kind: output, shape index: {}]  }
   0x1   :  { %11 = vsyncpa [#allocation6 + $0x1], 0 }
   0x2   :  { %12 = vsyncpa [#allocation9], 0 }
   0x3   :  { %13 = vsyncpa [#allocation7], 0 }
   0x4   :  { %15 = vsyncpa [#allocation7 + $0x1], 0  ;;  %s1383_s15 = smov 0   ;;  %s1385_s16 = smov 0  }
   0x5   :  { %s1387_s17 = smov 0  }
   0x6 LB: > { %s938_s18 = sadd.s32 4294967295, %s1343_s17   ;;  %s939_s19 = sadd.s32 4294967294, %s1343_s17   ;;  %s1343_s17 = sphi %s1387_s17, %s21_s17   ;;  %s1339_s16 = sphi %s1385_s16, %s1569_s16   ;;  %s1335_s15 = sphi %s1383_s15, %s1568_s15  }
   0x7   : > { %s33_s20 = sadd.s32 1, %s1339_s16  ;;  %p940_p0 = scmp.ge.s32.totalorder %s1343_s17, 1 }
   0x8   : > { %p35_p1 = scmp.ge.s32.totalorder %s33_s20, 2  ;;  %p159_p2 = scmp.lt.s32.totalorder %s1343_s17, 3 }
   0x9   : > { %p1405_p3 = scmp.eq.s32.totalorder %s938_s18, 0  ;;  %s1345_s23 = smov [#allocation8]  }
   0xa   : > { %s1571_s20 = smov (%p35_p1, %s33_s20), 0  ;;  %p1411_p4 = pnand %p940_p0, %p159_p2 }
   0xb   : > { %s1558_s21 = scalar_select %p1405_p3, 1, 0 }
   0xc   : > { %s1559_s22 = scalar_select %p1411_p4, 1, 0 }
   0xd   : > { %s171_s24 = sshll.u32 %s1345_s23, 4  ;;  %p1095_p5 = pneg %p1411_p4  ;;  %s172_s24 = int_to_ptr.vmem [resolvable:$true] %s171_s24 }
   0xe   : > { %s1346_s26 = smov [#allocation10]   ;;  %s1199_s30 = scalar_lea.hbm %s1551_s1, 4096 }
   0xf   : > { %p1420_p7 = pnand %p1405_p3, %p1095_p5  ;;  %s187_s27 = sshll.u32 %s1346_s26, 4  ;;  %s188_s27 = int_to_ptr.vmem [resolvable:$true] %s187_s27 }
  0x10   : > { %p1200_p9 = scmp.ne.s32.totalorder %s1551_s1, %s1199_s30  ;;  %p1206_p13 = scmp.lt.u32.totalorder %s1199_s30, %s1551_s1 }
  0x11   : > { %p1201_p10 = pneg %p1420_p7 }
  0x13   : > { %p1202_p11 = pnand %p1201_p10, %p1200_p9 }
  0x15   : > { %p1203_p12 = pneg %p1202_p11 }
  0x17   : > { %p1208_p0 = pnand %p1206_p13, %p1203_p12 }
  0x19   : > { %1211 = shalt.err (!%p1208_p0)
}
  0x1a   : > { %s1212_s9 = scalar_lea.vmem %s172_s24, 4096  ;;  %p1220_p6 = scmp.lt.s32.totalorder %s172_s24, %s172_s24 }
  0x1b   : > { %p1213_p1 = scmp.ne.s32.totalorder %s172_s24, %s1212_s9  ;;  %p1221_p8 = scmp.lt.s32.totalorder %s1212_s9, %s1212_s9 }
  0x1d   : > { %p1215_p2 = pnand %p1213_p1, %p1201_p10  ;;  %p1222_p3 = por %p1221_p8, %p1220_p6 }
  0x1f   : > { %p1216_p5 = pneg %p1215_p2 }
  0x21   : > { %p1223_p4 = pnand %p1222_p3, %p1216_p5 }
  0x23   : > { %1226 = shalt.err (!%p1223_p4)
}
  0x24   : > { %s1347_s10 = smov 64   ;;  %s1348_s11 = smov 4  }
  0x25   : > { %1098 = dma.hbm_to_vmem [thread:$0]  (!%p1420_p7), %s1551_s1, 4096, %s172_s24, [#allocation9], %s1347_s10, %s1347_s10, %s1348_s11  }
  0x26   : > { %s1227_s26 = scalar_lea.hbm %s1553_s3, 1024 }
  0x27   : > { %p1228_p3 = scmp.ne.s32.totalorder %s1553_s3, %s1227_s26  ;;  %p1234_p8 = scmp.lt.u32.totalorder %s1227_s26, %s1553_s3 }
  0x29   : > { %p1230_p4 = pnand %p1228_p3, %p1201_p10 }
  0x2b   : > { %p1231_p6 = pneg %p1230_p4 }
  0x2d   : > { %p1236_p11 = pnand %p1234_p8, %p1231_p6 }
  0x2f   : > { %1239 = shalt.err (!%p1236_p11)
}
  0x30   : > { %s1240_s24 = scalar_lea.vmem %s188_s27, 1024  ;;  %p1248_p1 = scmp.lt.s32.totalorder %s188_s27, %s188_s27 }
  0x31   : > { %p1241_p12 = scmp.ne.s32.totalorder %s188_s27, %s1240_s24  ;;  %p1249_p2 = scmp.lt.s32.totalorder %s1240_s24, %s1240_s24 }
  0x33   : > { %p1243_p13 = pnand %p1241_p12, %p1201_p10  ;;  %p1250_p5 = por %p1249_p2, %p1248_p1 }
  0x35   : > { %p1244_p0 = pneg %p1243_p13 }
  0x37   : > { %p1251_p9 = pnand %p1250_p5, %p1244_p0 }
  0x39   : > { %1254 = shalt.err (!%p1251_p9)
}
  0x3a   : > { %1101 = dma.hbm_to_vmem [thread:$0]  (!%p1420_p7), %s1553_s3, 1024, %s188_s27, [#allocation9], %s1347_s10, %s1347_s10, %s1348_s11  }
  0x3b   : > { %p1561_p3 = scmp.lt.s32.totalorder %s1343_s17, 2  ;;  %p1562_p4 = scmp.eq.s32.totalorder %s1343_s17, 0 }
  0x3c   : > { %s1349_s9 = smov [#allocation5]   ;;  %s1255_s25 = scalar_lea.hbm %s1550_s0, 1024 }
  0x3d   : > { %p1472_p6 = pnand %p1562_p4, %p1561_p3  ;;  %s215_s12 = sshll.u32 %s1349_s9, 4  ;;  %s216_s12 = int_to_ptr.vmem [resolvable:$true] %s215_s12 }
  0x3e   : > { %p1256_p10 = scmp.ne.s32.totalorder %s1550_s0, %s1255_s25  ;;  %p1262_p11 = scmp.lt.u32.totalorder %s1255_s25, %s1550_s0 }
  0x3f   : > { %p1257_p7 = pneg %p1472_p6 }
  0x41   : > { %p1258_p9 = pnand %p1257_p7, %p1256_p10 }
  0x43   : > { %p1259_p8 = pneg %p1258_p9 }
  0x45   : > { %p1264_p12 = pnand %p1262_p11, %p1259_p8 }
  0x47   : > { %1267 = shalt.err (!%p1264_p12)
}
  0x48   : > { %s1268_s11 = scalar_lea.vmem %s216_s12, 1024  ;;  %s1275_s28 = scalar_lea.vmem %s216_s12, 2048 }
  0x49   : > { %p1269_p13 = scmp.ne.s32.totalorder %s216_s12, %s1268_s11  ;;  %p1276_p2 = scmp.lt.s32.totalorder %s216_s12, %s216_s12 }
  0x4a   : > { %p1277_p5 = scmp.lt.s32.totalorder %s1275_s28, %s1268_s11 }
  0x4b   : > { %p1271_p0 = pnand %p1269_p13, %p1257_p7 }
  0x4c   : > { %p1278_p3 = por %p1277_p5, %p1276_p2 }
  0x4d   : > { %p1272_p1 = pneg %p1271_p0 }
  0x4f   : > { %p1279_p4 = pnand %p1278_p3, %p1272_p1 }
  0x51   : > { %1282 = shalt.err (!%p1279_p4)
}
  0x52   : > { %s1350_s29 = smov 512   ;;  %s1351_s30 = smov 32  }
  0x53   : > { %1105 = dma.hbm_to_vmem [thread:$0]  (!%p1472_p6), %s1550_s0, 1024, %s216_s12, [#allocation6], %s1350_s29, %s1350_s29, %s1351_s30  }
  0x54   : > { %p1564_p10 = scmp.ne.s32.totalorder %s1559_s22, 0 }
  0x55   : > { %p1565_p7 = scmp.ne.s32.totalorder (!%p1564_p10), %s1558_s21, 0 }
  0x56   : > { %227 = sbr.rel (%p1564_p10) target bundleno = 649 (0x289), region = 36 }
  0x5d   : > { %1322 = dma.done.wait (%p1565_p7), [#allocation6], 1024  }
  0x5e   : > { %1324 = vsyncadd (%p1565_p7), [#allocation6], 4294966272 }
  0x5f   : > { %1326 = dma.done.wait (%p1565_p7), [#allocation9], 5120  }
  0x60   : > { %1328 = vsyncadd (%p1565_p7), [#allocation9], 4294962176  ;;  %p949_p9 = scmp.ne.s32.totalorder %s1335_s15, 0 }
  0x61   : > { %v1157_v0 = vld [vmem:[#allocation8 + $0x40] sm:$0xff] (!%p949_p9)   ;;  %v1161_v4 = vld [vmem:[#allocation8 + $0x48] sm:$0xff] (!%p949_p9)   ;;  %v1165_v8 = vld [vmem:[#allocation8 + $0x50] sm:$0xff] (!%p949_p9)   ;;  %v1352_v44 = vmov (!%p949_p9), 0.0  }
  0x62   : > { %276 = sbr.rel (%p949_p9) target bundleno = 370 (0x172), region = 52  ;;  %v1158_v1 = vld [vmem:[#allocation8 + $0xc0] sm:$0xff] (!%p949_p9)   ;;  %1006 = vmatprep.subr.bf16.mxu0 (!%p949_p9), %v1157_v0  ;;  %v1162_v5 = vld [vmem:[#allocation8 + $0xc8] sm:$0xff] (!%p949_p9)   ;;  %v1166_v9 = vld [vmem:[#allocation8 + $0xd0] sm:$0xff] (!%p949_p9)   ;;  %281 = vst [vmem:[#allocation3] sm:$0x1] (!%p949_p9), %v1352_v44 }
  0x63   : > { %v1159_v2 = vld [vmem:[#allocation8] sm:$0xff] (!%p949_p9)   ;;  %1028 = vmatprep.subr.bf16.mxu1 (!%p949_p9), %v1158_v1  ;;  %v1163_v6 = vld [vmem:[#allocation8 + $0x8] sm:$0xff] (!%p949_p9)   ;;  %v1167_v10 = vld [vmem:[#allocation8 + $0x10] sm:$0xff] (!%p949_p9)   ;;  %282 = vst [vmem:[#allocation4] sm:$0x1] (!%p949_p9), %v1352_v44 }
  0x64   : > { %v1160_v3 = vld [vmem:[#allocation8 + $0x80] sm:$0xff] (!%p949_p9)   ;;  %1007 = vmatpush3.bf16.msra.mxu0 (!%p949_p9), %v1159_v2  ;;  %v1164_v7 = vld [vmem:[#allocation8 + $0x88] sm:$0xff] (!%p949_p9)   ;;  %v1168_v11 = vld [vmem:[#allocation8 + $0x90] sm:$0xff] (!%p949_p9)  }
  0x65   : > { %1029 = vmatpush3.bf16.msra.mxu1 (!%p949_p9), %v1160_v3  ;;  %1008 = vmatprep.subr.bf16.mxu0 (!%p949_p9), %v1161_v4  ;;  %v1169_v12 = vld [vmem:[#allocation8 + $0x58] sm:$0xff] (!%p949_p9)   ;;  %v1173_v16 = vld [vmem:[#allocation8 + $0x60] sm:$0xff] (!%p949_p9)   ;;  %v1177_v20 = vld [vmem:[#allocation8 + $0x68] sm:$0xff] (!%p949_p9)  }
  0x66   : > { %1030 = vmatprep.subr.bf16.mxu1 (!%p949_p9), %v1162_v5  ;;  %v1170_v13 = vld [vmem:[#allocation8 + $0xd8] sm:$0xff] (!%p949_p9)   ;;  %v1174_v17 = vld [vmem:[#allocation8 + $0xe0] sm:$0xff] (!%p949_p9)   ;;  %v1178_v21 = vld [vmem:[#allocation8 + $0xe8] sm:$0xff] (!%p949_p9)  }
  0x67   : > { %v1171_v14 = vld [vmem:[#allocation8 + $0x18] sm:$0xff] (!%p949_p9)   ;;  %v1175_v18 = vld [vmem:[#allocation8 + $0x20] sm:$0xff] (!%p949_p9)   ;;  %v1179_v22 = vld [vmem:[#allocation8 + $0x28] sm:$0xff] (!%p949_p9)  }
  0x68   : > { %1009 = vmatpush3.bf16.msra.mxu0 (!%p949_p9), %v1163_v6  ;;  %v1172_v15 = vld [vmem:[#allocation8 + $0x98] sm:$0xff] (!%p949_p9)   ;;  %v1176_v19 = vld [vmem:[#allocation8 + $0xa0] sm:$0xff] (!%p949_p9)   ;;  %v1180_v23 = vld [vmem:[#allocation8 + $0xa8] sm:$0xff] (!%p949_p9)  }
  0x69   : > { %1031 = vmatpush3.bf16.msra.mxu1 %v1164_v7  ;;  %1010 = vmatprep.subr.bf16.mxu0 %v1165_v8  ;;  %v1181_v24 = vld [vmem:[#allocation8 + $0x70] sm:$0xff]   ;;  %v1185_v28 = vld [vmem:[#allocation8 + $0x78] sm:$0xff]   ;;  %v284_v32 = vld [vmem:[#allocation5 + $0x8] sm:$0xff] }
  0x6a   : > { %1032 = vmatprep.subr.bf16.mxu1 %v1166_v9  ;;  %v1182_v25 = vld [vmem:[#allocation8 + $0xf0] sm:$0xff]   ;;  %v1186_v29 = vld [vmem:[#allocation8 + $0xf8] sm:$0xff]   ;;  %v288_v33 = vld [vmem:[#allocation5 + $0x28] sm:$0xff] }
  0x6b   : > { %v1183_v26 = vld [vmem:[#allocation8 + $0x30] sm:$0xff]   ;;  %v1187_v30 = vld [vmem:[#allocation8 + $0x38] sm:$0xff]   ;;  %v292_v35 = vpack.c.bf16 %v288_v33, %v284_v32  ;;  %v283_v37 = vld [vmem:[#allocation5] sm:$0xff] }
  0x6c   : > { %1011 = vmatpush3.bf16.msra.mxu0 %v1167_v10  ;;  %v1184_v27 = vld [vmem:[#allocation8 + $0xb0] sm:$0xff]   ;;  %v1188_v31 = vld [vmem:[#allocation8 + $0xb8] sm:$0xff]   ;;  %v287_v38 = vld [vmem:[#allocation5 + $0x20] sm:$0xff] }
  0x6d   : > { %1033 = vmatpush3.bf16.msra.mxu1 %v1168_v11  ;;  %1012 = vmatprep.subr.bf16.mxu0 %v1169_v12  ;;  %v286_v34 = vld [vmem:[#allocation5 + $0x18] sm:$0xff]  ;;  %v291_v40 = vpack.c.bf16 %v287_v38, %v283_v37  ;;  %v285_v41 = vld [vmem:[#allocation5 + $0x10] sm:$0xff] }
  0x6e   : > { %1034 = vmatprep.subr.bf16.mxu1 %v1170_v13  ;;  %v290_v36 = vld [vmem:[#allocation5 + $0x38] sm:$0xff]  ;;  %v289_v42 = vld [vmem:[#allocation5 + $0x30] sm:$0xff]  ;;  %583 = vmatprep.mubr.bf16.mxu0 %v292_v35 }
  0x6f   : > { %v294_v39 = vpack.c.bf16 %v290_v36, %v286_v34  ;;  %v293_v43 = vpack.c.bf16 %v289_v42, %v285_v41  ;;  %v633_v8 = vld [vmem:[#allocation3] sm:$0x1]  ;;  %v643_v11 = vld [vmem:[#allocation4] sm:$0x1] }
  0x70   : > { %1013 = vmatpush3.bf16.msra.mxu0 %v1171_v14 }
  0x71   : > { %1035 = vmatpush3.bf16.msra.mxu1 %v1172_v15  ;;  %1014 = vmatprep.subr.bf16.mxu0 %v1173_v16 }
  0x72   : > { %1036 = vmatprep.subr.bf16.mxu1 %v1174_v17  ;;  %624 = vmatprep.mubr.bf16.mxu1 %v294_v39 }
  0x74   : > { %1015 = vmatpush3.bf16.msra.mxu0 %v1175_v18 }
  0x75   : > { %1037 = vmatpush3.bf16.msra.mxu1 %v1176_v19  ;;  %1016 = vmatprep.subr.bf16.mxu0 %v1177_v20 }
  0x76   : > { %1038 = vmatprep.subr.bf16.mxu1 %v1178_v21 }
  0x78   : > { %1017 = vmatpush3.bf16.msra.mxu0 %v1179_v22 }
  0x79   : > { %1039 = vmatpush3.bf16.msra.mxu1 %v1180_v23  ;;  %1018 = vmatprep.subr.bf16.mxu0 %v1181_v24 }
  0x7a   : > { %1040 = vmatprep.subr.bf16.mxu1 %v1182_v25 }
  0x7c   : > { %1019 = vmatpush3.bf16.msra.mxu0 %v1183_v26 }
  0x7d   : > { %1041 = vmatpush3.bf16.msra.mxu1 %v1184_v27  ;;  %1020 = vmatprep.subr.bf16.mxu0 %v1185_v28 }
  0x7e   : > { %1042 = vmatprep.subr.bf16.mxu1 %v1186_v29 }
  0x80   : > { %1021 = vmatpush3.bf16.msra.mxu0 %v1187_v30 }
  0x81   : > { %1043 = vmatpush3.bf16.msra.mxu1 %v1188_v31 }
  0x83   : > { %584 = vmatmul.mubr.bf16.vlgmr.msra.gmra.mrb[0].mxu0 %v291_v40 }
  0x84   : > { %625 = vmatmul.mubr.bf16.vlgmr.msra.gmra.mrb[0].mxu1 %v293_v43 }
 0x156   : > { %v1022_v45 = vpop.f32.mrb[0].mxu0 }
 0x157   : > { %v1044_v46 = vpop.f32.mrb[0].mxu1  ;;  %v1023_v47 = vpop.f32.mrb[1].mxu0 }
 0x158   : > { %v1024_v48 = vadd.f32 %v1023_v47, %v1022_v45  ;;  %v1045_v49 = vpop.f32.mrb[1].mxu1  ;;  %v1025_v50 = vpop.f32.mrb[2].mxu0 }
 0x159   : > { %v1046_v51 = vadd.f32 %v1045_v49, %v1044_v46  ;;  %v1047_v52 = vpop.f32.mrb[2].mxu1  ;;  %v1026_v53 = vpop.f32.mrb[3].mxu0 }
 0x15a   : > { %v1027_v54 = vadd.f32 %v1026_v53, %v1025_v50  ;;  %v1048_v55 = vpop.f32.mrb[3].mxu1 }
 0x15b   : > { %v627_v56 = vadd.f32 %v1046_v51, %v1024_v48  ;;  %v1049_v57 = vadd.f32 %v1048_v55, %v1047_v52 }
 0x15d   : > { %656 = vst [vmem:[#allocation2] sm:$0xff] %v627_v56  ;;  %v630_v58 = vadd.f32 %v1049_v57, %v1027_v54  ;;  %v644_v59 = vmul.f32 %v627_v56, %v627_v56 }
 0x15f   : > { %v634_v60 = vadd.f32 %v630_v58, %v627_v56  ;;  %v645_v61 = vmul.f32 %v630_v58, %v630_v58  ;;  %657 = vst [vmem:[#allocation2 + $0x8] sm:$0xff] %v630_v58 }
 0x161   : > { %v635_v62 = vrot.slane %v634_v60, 4  ;;  %v646_v63 = vadd.f32 %v645_v61, %v644_v59 }
 0x163   : > { %v636_v0 = vadd.f32 %v635_v62, %v634_v60  ;;  %v647_v1 = vrot.slane %v646_v63, 4 }
 0x165   : > { %v637_v2 = vrot.slane %v636_v0, 2  ;;  %v648_v3 = vadd.f32 %v647_v1, %v646_v63 }
 0x167   : > { %v638_v4 = vadd.f32 %v637_v2, %v636_v0  ;;  %v649_v5 = vrot.slane %v648_v3, 2 }
 0x169   : > { %v639_v6 = vrot.slane %v638_v4, 1  ;;  %v650_v7 = vadd.f32 %v649_v5, %v648_v3 }
 0x16b   : > { %v640_v9 = vadd.f32 %v639_v6, %v638_v4  ;;  %v651_v10 = vrot.slane %v650_v7, 1 }
 0x16d   : > { %v641_v12 = vadd.f32 %v640_v9, %v633_v8  ;;  %v652_v13 = vadd.f32 %v651_v10, %v650_v7 }
 0x16f   : > { %642 = vst [vmem:[#allocation3] sm:$0x1] %v641_v12  ;;  %v653_v14 = vadd.f32 %v652_v13, %v643_v11 }
 0x171   : > { %654 = vst [vmem:[#allocation4] sm:$0x1] %v653_v14 }
 0x172 PF: > { %p982_p6 = scmp.ne.s32.totalorder %s1335_s15, 1 }
 0x173   : > { %v1189_v15 = vld [vmem:[#allocation10] sm:$0xff] (!%p982_p6)   ;;  %v1353_v16 = vmov (!%p982_p6), 0.0   ;;  %v1190_v17 = vld [vmem:[#allocation10 + $0x8] sm:$0xff] (!%p982_p6)   ;;  %vm1354_vm0 = vmmov (!%p982_p6), 0   ;;  %v1191_v18 = vld [vmem:[#allocation10 + $0x10] sm:$0xff] (!%p982_p6)   ;;  %v678_v25 = vlaneseq (!%p982_p6) }
 0x174   : > { %661 = sbr.rel (%p982_p6) target bundleno = 625 (0x271), region = 60  ;;  %1059 = vmatprep.subr.bf16.mxu0 (!%p982_p6), %v1353_v16  ;;  %1075 = vmatprep.mubr.msk.bf16.mxu0 (!%p982_p6), %vm1354_vm0, %v1353_v16  ;;  %v1192_v22 = vld [vmem:[#allocation10 + $0x18] sm:$0xff] (!%p982_p6)   ;;  %v1193_v27 = vld [vmem:[#allocation10 + $0x20] sm:$0xff] (!%p982_p6)   ;;  %v1194_v30 = vld [vmem:[#allocation10 + $0x28] sm:$0xff] (!%p982_p6)  }
 0x175   : > { %1060 = vmatpush3.bf16.msra.mxu0 (!%p982_p6), %v1189_v15  ;;  %v679_v29 = vshrl.u32 (!%p982_p6), %v678_v25, 7  ;;  %v1195_v32 = vld [vmem:[#allocation10 + $0x30] sm:$0xff] (!%p982_p6)   ;;  %v662_v34 = vld [vmem:[%s1552_s2] sm:$0x1] (!%p982_p6)  ;;  %v1196_v37 = vld [vmem:[#allocation10 + $0x38] sm:$0xff] (!%p982_p6)  }
 0x176   : > { %1061 = vmatprep.subr.bf16.mxu0 (!%p982_p6), %v1353_v16  ;;  %v665_v19 = vld [vmem:[#allocation3] sm:$0x1] (!%p982_p6)  ;;  %v675_v35 = vld [vmem:[#allocation2] sm:$0xff] (!%p982_p6)  ;;  %v676_v36 = vld [vmem:[#allocation2 + $0x8] sm:$0xff] (!%p982_p6) }
 0x177   : > { %v666_v20 = vmul.f32 (!%p982_p6), 0.083333336, %v665_v19  ;;  %v680_v31 = vsub.s32 (!%p982_p6), 0, %v679_v29  ;;  %v983_v43 = vld [vmem:[%s1552_s2 + $0x1] ss:$0 sm:$0xff] (!%p982_p6) }
 0x178   : > { %v667_v21 = vld [vmem:[#allocation4] sm:$0x1] (!%p982_p6)  ;;  %v984_v51 = vld [vmem:[%s1552_s2 + $0x2] ss:$0 sm:$0xff] (!%p982_p6) }
 0x179   : > { %1062 = vmatpush3.bf16.msra.mxu0 (!%p982_p6), %v1190_v17  ;;  %v668_v23 = vmul.f32 (!%p982_p6), 0.083333336, %v667_v21  ;;  %v669_v24 = vmul.f32 (!%p982_p6), %v666_v20, %v666_v20  ;;  %v681_v33 = vrot.slane (!%p982_p6), %v666_v20, %v680_v31 }
 0x17a   : > { %1063 = vmatprep.subr.bf16.mxu0 (!%p982_p6), %v1353_v16 }
 0x17b   : > { %v670_v26 = vsub.f32 %v668_v23, %v669_v24  ;;  %v683_v40 = vsub.f32 %v675_v35, %v681_v33  ;;  %v684_v41 = vsub.f32 %v676_v36, %v681_v33 }
 0x17d   : > { %1064 = vmatpush3.bf16.msra.mxu0 %v1191_v18  ;;  %v671_v28 = vadd.f32 1e-05, %v670_v26 }
 0x17e   : > { %1065 = vmatprep.subr.bf16.mxu0 %v1353_v16 }
 0x17f   : > { %1197 = vrsqrt.f32 %v671_v28 }
 0x181   : > { %1066 = vmatpush3.bf16.msra.mxu0 %v1192_v22 }
 0x182   : > { %1067 = vmatprep.subr.bf16.mxu0 %v1353_v16 }
 0x185   : > { %1068 = vmatpush3.bf16.msra.mxu0 %v1193_v27 }
 0x186   : > { %1069 = vmatprep.subr.bf16.mxu0 %v1353_v16 }
 0x189   : > { %1070 = vmatpush3.bf16.msra.mxu0 %v1194_v30  ;;  %v1198_v38 = vpop.eup %1197 }
 0x18a   : > { %1071 = vmatprep.subr.bf16.mxu0 %v1353_v16  ;;  %v673_v39 = vmul.f32 %v1198_v38, %v662_v34 }
 0x18c   : > { %v688_v42 = vrot.slane %v673_v39, %v680_v31 }
 0x18d   : > { %1072 = vmatpush3.bf16.msra.mxu0 %v1195_v32 }
 0x18e   : > { %1073 = vmatprep.subr.bf16.mxu0 %v1353_v16  ;;  %v689_v44 = vmul.f32 %v688_v42, %v683_v40  ;;  %v690_v45 = vmul.f32 %v688_v42, %v684_v41 }
 0x190   : > { %v695_v46 = vadd.f32 %v983_v43, %v689_v44  ;;  %v696_v47 = vadd.f32 %v983_v43, %v690_v45 }
 0x191   : > { %1074 = vmatpush3.bf16.msra.mxu0 %v1196_v37 }
 0x192   : > { %v697_v48 = vmax.f32 %v695_v46, 0.0  ;;  %v698_v49 = vmax.f32 %v696_v47, 0.0 }
 0x194   : > { %v699_v50 = vpack.c.bf16 %v698_v49, %v697_v48 }
 0x196   : > { %1076 = vmatmul.mubr.bf16.vlgmr.msra.gmra.mrb[0].mxu0 %v699_v50 }
 0x269   : > { %v802_v52 = vpop.f32.mrb[0].mxu0 }
 0x26a   : > { %v1077_v53 = vpop.f32.mrb[1].mxu0  ;;  %v803_v55 = vadd.f32 %v984_v51, %v802_v52 }
 0x26b   : > { %v805_v54 = vpop.f32.mrb[2].mxu0 }
 0x26c   : > { %v806_v56 = vadd.f32 %v984_v51, %v805_v54  ;;  %v1078_v57 = vpop.f32.mrb[3].mxu0 }
 0x26e   : > { %v1004_v58 = vpack.c.bf16 %v806_v56, %v803_v55 }
 0x270   : > { %1005 = vst [vmem:[#allocation11] sm:$0xff] %v1004_v58  }
 0x271 PF: > { %p1515_p8 = scmp.eq.s32.totalorder %s938_s18, 1  ;;  %s1355_s12 = smov [#allocation11]  }
 0x272   : > { %s834_s13 = sshll.u32 %s1355_s12, 4  ;;  %s835_s13 = int_to_ptr.vmem [resolvable:$true] %s834_s13 }
 0x273   : > { %s1283_s14 = scalar_lea.vmem %s835_s13, 128  ;;  %s1289_s25 = scalar_lea.vmem %s835_s13, 256 }
 0x274   : > { %p1284_p11 = scmp.ne.s32.totalorder %s835_s13, %s1283_s14  ;;  %p1290_p0 = scmp.lt.s32.totalorder %s835_s13, %s835_s13 }
 0x275   : > { %p1291_p1 = scmp.lt.s32.totalorder %s1289_s25, %s1283_s14 }
 0x276   : > { %p1285_p12 = pnand %p1284_p11, %p1515_p8 }
 0x277   : > { %p1292_p2 = por %p1291_p1, %p1290_p0 }
 0x278   : > { %p1286_p13 = pneg %p1285_p12 }
 0x27a   : > { %p1293_p5 = pnand %p1292_p2, %p1286_p13 }
 0x27c   : > { %1296 = shalt.err (!%p1293_p5)
}
 0x27d   : > { %s1297_s26 = scalar_lea.hbm %s1554_s4, 128 }
 0x27e   : > { %p1298_p3 = scmp.ne.s32.totalorder %s1554_s4, %s1297_s26  ;;  %p1303_p7 = scmp.lt.u32.totalorder %s1297_s26, %s1554_s4 }
 0x280   : > { %p1299_p4 = pnand %p1298_p3, %p1515_p8 }
 0x282   : > { %p1300_p10 = pneg %p1299_p4 }
 0x284   : > { %p1305_p9 = pnand %p1303_p7, %p1300_p10 }
 0x286   : > { %1308 = shalt.err (!%p1305_p9)
}
 0x287   : > { %s1356_s29 = smov 64   ;;  %s1357_s30 = smov 4  }
 0x288   : > { %1092 = dma.vmem_to_hbm [thread:$0]  (%p1515_p8), %s835_s13, 128, %s1554_s4, [#allocation7], %s1356_s29, %s1356_s29, %s1357_s30  }
 0x289 PF: > { %p1119_p6 = scmp.eq.s32.totalorder %s939_s19, 1  ;;  %p1567_p11 = scmp.ge.s32.totalorder %s1343_s17, 2 }
 0x28b   : > { %p1107_p12 = pnand %p1119_p6, %p1567_p11 }
 0x28d   : > { %1330 = dma.done.wait (!%p1107_p12), [#allocation7], 128  }
 0x28e   : > { %1332 = vsyncadd (!%p1107_p12), [#allocation7], 4294967168  ;;  %s21_s17 = sadd.s32 1, %s1343_s17   ;;  %s1568_s15 = smov %s1339_s16 }
 0x28f   : > { %p18_p13 = scmp.ge.s32.totalorder %s21_s17, 4   ;;  %s1569_s16 = smov %s1571_s20 }
 0x291   :  { %20 = sbr.rel (!%p18_p13) target bundleno = 6 (0x6), region = 103 }
 0x298   :  { %855 = vsyncpa [#allocation6], 1 }
 0x299   :  { %857 = vsyncpa [#allocation6 + $0x1], 1 }
 0x29a   :  { %858 = vsyncpa [#allocation9], 1 }
 0x29b   :  { %859 = vsyncpa [#allocation7], 1 }
 0x29c   :  { %861 = vsyncpa [#allocation7 + $0x1], 1 }

</bundles_post_ra>
